<compile_context>
chip_gen: v5e
topology: v5e:2x2
jax: 0.10.0
libtpu: 0.0.40
codegen_flags: <defaults>
</compile_context>

<pallas_src>
import jax
import jax.numpy as jnp
from jax.experimental import pallas as pl
from jax.experimental.pallas import tpu as pltpu  # noqa: F401  (kept for TPU-specific extensions)


def make_lt_matrix(L, kernel_size, stride):
    """lt_matrix from the PyTorch forward: sum of right-shifted identities."""
    lt = jnp.zeros((L, L), dtype=jnp.float32)
    for i in range(kernel_size // stride):
        n = L - stride * i
        eye = jnp.eye(n, dtype=jnp.float32)
        # F.pad(eye, (i*stride, 0, 0, i*stride)): pad columns on the left, rows at the bottom.
        lt = lt + jnp.pad(eye, ((0, stride * i), (stride * i, 0)))
    return lt


def stgcn_fused_kernel(x_ref, w_ref, g_ref, gamma_ref, beta_ref, o_ref):
    """Whole-layer fused forward (conv + graph/temporal matmuls + BN + ReLU + residual + ReLU).

    x_ref:     (N, C_in, LV)    input, LV = L*V flattened pixels (V fastest, NCHW order)
    w_ref:     (P*C_out, C_in)  1x1 conv weight, all partitions concatenated along rows
    g_ref:     (P, LV, LV)      fused graph+temporal operator, G[p] = kron(lt, A[p])
    gamma_ref: (1, C_out, 1)    BatchNorm scale
    beta_ref:  (1, C_out, 1)    BatchNorm shift
    o_ref:     (N, C_out, LV)   output
    """
    N, C_in, LV = x_ref.shape
    P = g_ref.shape[0]
    C_out = w_ref.shape[0] // P

    x = x_ref[...]                     # (N, C_in, LV)
    w = w_ref[...]                     # (P*C_out, C_in)

    # ---- 1x1 conv: one MXU dot per sample covering all P partitions' output channels ----
    ys = [jnp.dot(w, x[n], preferred_element_type=jnp.float32) for n in range(N)]  # (P*C_out, LV)

    # ---- fused graph + temporal matmul: one dot per partition, samples batched on rows ----
    acc = jnp.zeros((N * C_out, LV), dtype=jnp.float32)
    for p in range(P):                 # static unroll; num_partitions is small
        lhs = jnp.concatenate(
            [ys[n][p * C_out:(p + 1) * C_out, :] for n in range(N)], axis=0)  # (N*C_out, LV)
        acc = acc + jnp.dot(lhs, g_ref[p], preferred_element_type=jnp.float32)

    pre = acc.reshape(N, C_out, LV)    # pre-BatchNorm activations, rows were (n, c)

    # ---- training-mode BatchNorm2d (batch stats over N, L, V) + ReLU + residual + ReLU ----
    cnt = jnp.float32(N * LV)
    mean = jnp.sum(jnp.sum(pre, axis=2, keepdims=True), axis=0, keepdims=True) / cnt
    d = pre - mean
    var = jnp.sum(jnp.sum(d * d, axis=2, keepdims=True), axis=0, keepdims=True) / cnt  # biased var
    inv = jax.lax.rsqrt(var + 1e-5)
    h = gamma_ref[...] * (d * inv) + beta_ref[...]
    h = jnp.maximum(h, 0.0)            # self.bn_relu: ReLU
    h = h + x                          # residual branch (identity: in_ch == out_ch, stride == 1)
    h = jnp.maximum(h, 0.0)            # self.do = Sequential(ReLU, Dropout(p=0.0))
    # TODO(synk): stochastic training-mode Dropout for p > 0 and BN running-stat updates
    #             are not implemented; the demo config (p=0.0) makes Dropout the identity.
    o_ref[...] = h


def stgcn_layer_forward(x, A, conv_w, bn_gamma, bn_beta, *, kernel_size, stride):
    """x: (N, C_in, L, V) NCHW; A: (P, V, V); conv_w: (P*C_out, C_in). Returns (N, C_out, L, V)."""
    N, C_in, L, V = x.shape
    P = A.shape[0]
    C_out = conv_w.shape[0] // P
    assert C_in == C_out and stride == 1, "demo implements the identity-residual configuration"
    LV = L * V

    # ---- host glue: fold the temporal operator into the per-partition graph operator ----
    lt = make_lt_matrix(L, kernel_size, stride)
    # G[p] acts on the flat pixel axis (index l*V + v): G[p][lv, mw] = lt[l, m] * A[p][v, w].
    G = jnp.stack([jnp.kron(lt, A[p]) for p in range(P)]).astype(jnp.float32)   # (P, LV, LV)
    x_flat = x.reshape(N, C_in, LV).astype(jnp.float32)

    # ---- single fused kernel, single grid point (whole problem fits comfortably in VMEM) ----
    out_flat = pl.pallas_call(
        stgcn_fused_kernel,
        out_shape=jax.ShapeDtypeStruct((N, C_out, LV), jnp.float32),
    )(x_flat, conv_w.astype(jnp.float32), G,
      bn_gamma.reshape(1, C_out, 1).astype(jnp.float32),
      bn_beta.reshape(1, C_out, 1).astype(jnp.float32))

    return out_flat.reshape(N, C_out, L, V)


def stgcn_reference(x, A, conv_w, gamma, beta, lt, C_out, eps=1e-5):
    """Plain-JAX mirror of the PyTorch forward (for validation)."""
    N, C_in, L, V = x.shape
    P = A.shape[0]
    y = jnp.einsum("oc,nclv->nolv", conv_w, x)          # 1x1 conv, no bias
    y = y.reshape(N, P, C_out, L, V)                    # split along channels, per partition
    z = jnp.einsum("npclv,pvw->npclw", y, A)            # matmul with adjacency
    u = jnp.einsum("npclw,lm->npcmw", z, lt)            # matmul with lt_matrix
    s = u.sum(axis=1)                                   # sum over partitions -> (N, C, L, V)
    mean = s.mean(axis=(0, 2, 3), keepdims=True)
    var = ((s - mean) ** 2).mean(axis=(0, 2, 3), keepdims=True)
    h = gamma.reshape(1, -1, 1, 1) * (s - mean) * jax.lax.rsqrt(var + eps) + beta.reshape(1, -1, 1, 1)
    h = jnp.maximum(h, 0.0)                             # bn_relu
    h = jnp.maximum(h + x, 0.0)                         # + residual, then do's ReLU (dropout p=0)
    return h


if __name__ == "__main__":
    N, C_in, C_out, L, V, P = 2, 4, 4, 8, 16, 3
    kernel_size, stride = 3, 1

    key = jax.random.PRNGKey(0)
    k1, k2, k3 = jax.random.split(key, 3)
    x = jax.random.normal(k1, (N, C_in, L, V), dtype=jnp.float32)
    A = jax.random.uniform(k2, (P, V, V), dtype=jnp.float32) / V          # synthetic partitions
    bound = 1.0 / (C_in ** 0.5)
    conv_w = jax.random.uniform(k3, (C_out * P, C_in), dtype=jnp.float32,
                                minval=-bound, maxval=bound)              # Conv2d(C_in, C_out*P, 1, bias=False)
    bn_gamma = jnp.ones((C_out,), dtype=jnp.float32)                      # BatchNorm2d default init
    bn_beta = jnp.zeros((C_out,), dtype=jnp.float32)

    out = stgcn_layer_forward(x, A, conv_w, bn_gamma, bn_beta,
                              kernel_size=kernel_size, stride=stride)
    out = jax.block_until_ready(out)

    ref = stgcn_reference(x, A, conv_w, bn_gamma, bn_beta,
                          make_lt_matrix(L, kernel_size, stride), C_out)
    assert out.shape == (N, C_out, L, V)
    max_err = float(jnp.max(jnp.abs(out - ref)))
    assert max_err < 1e-3, f"kernel vs reference mismatch: max abs err = {max_err}"
    print("KERNEL_OK")
</pallas_src>

<mosaic_0001>
module attributes {stable_mosaic.version = 11 : i64} {
  func.func @stgcn_fused_kernel(%arg0: memref<2x4x128xf32, #tpu.memory_space<vmem>>, %arg1: memref<12x4xf32, #tpu.memory_space<vmem>>, %arg2: memref<3x128x128xf32, #tpu.memory_space<vmem>>, %arg3: memref<1x4x1xf32, #tpu.memory_space<vmem>>, %arg4: memref<1x4x1xf32, #tpu.memory_space<vmem>>, %arg5: memref<2x4x128xf32, #tpu.memory_space<vmem>>) attributes {dimension_semantics = [], scalar_prefetch = 0 : i64, scratch_operands = 0 : i64, tpu.core_type = #tpu.core_type<tc>} {
    %c0 = arith.constant 0 : index
    %c0_0 = arith.constant 0 : index
    %c0_1 = arith.constant 0 : index
    %0 = vector.load %arg0[%c0, %c0_0, %c0_1] : memref<2x4x128xf32, #tpu.memory_space<vmem>>, vector<2x4x128xf32>
    %c0_2 = arith.constant 0 : index
    %c0_3 = arith.constant 0 : index
    %1 = vector.load %arg1[%c0_2, %c0_3] : memref<12x4xf32, #tpu.memory_space<vmem>>, vector<12x4xf32>
    %2 = vector.extract_strided_slice %0 {offsets = [0, 0, 0], sizes = [1, 4, 128], strides = [1, 1, 1]} : vector<2x4x128xf32> to vector<1x4x128xf32>
    %3 = vector.shape_cast %2 : vector<1x4x128xf32> to vector<4x128xf32>
    %cst = arith.constant dense<0.000000e+00> : vector<12x128xf32>
    %4 = tpu.matmul %1, %3, %cst {dimension_numbers = #tpu.dot_dimension_numbers<[1], [0], [0], [1], [0, 0, 1, 1], [], []>} : vector<12x4xf32>, vector<4x128xf32>, vector<12x128xf32> -> vector<12x128xf32>
    %5 = vector.extract_strided_slice %0 {offsets = [1, 0, 0], sizes = [1, 4, 128], strides = [1, 1, 1]} : vector<2x4x128xf32> to vector<1x4x128xf32>
    %6 = vector.shape_cast %5 : vector<1x4x128xf32> to vector<4x128xf32>
    %cst_4 = arith.constant dense<0.000000e+00> : vector<12x128xf32>
    %7 = tpu.matmul %1, %6, %cst_4 {dimension_numbers = #tpu.dot_dimension_numbers<[1], [0], [0], [1], [0, 0, 1, 1], [], []>} : vector<12x4xf32>, vector<4x128xf32>, vector<12x128xf32> -> vector<12x128xf32>
    %cst_5 = arith.constant 0.000000e+00 : f32
    %8 = vector.broadcast %cst_5 : f32 to vector<8x128xf32>
    %9 = vector.extract_strided_slice %4 {offsets = [0, 0], sizes = [4, 128], strides = [1, 1]} : vector<12x128xf32> to vector<4x128xf32>
    %10 = vector.extract_strided_slice %7 {offsets = [0, 0], sizes = [4, 128], strides = [1, 1]} : vector<12x128xf32> to vector<4x128xf32>
    %11 = tpu.concatenate %9, %10 in 0 : vector<4x128xf32>, vector<4x128xf32> -> vector<8x128xf32>
    %c0_6 = arith.constant 0 : index
    %c0_7 = arith.constant 0 : index
    %c0_8 = arith.constant 0 : index
    %12 = vector.load %arg2[%c0_6, %c0_7, %c0_8] : memref<3x128x128xf32, #tpu.memory_space<vmem>>, vector<1x128x128xf32>
    %13 = vector.shape_cast %12 : vector<1x128x128xf32> to vector<128x128xf32>
    %cst_9 = arith.constant dense<0.000000e+00> : vector<8x128xf32>
    %14 = tpu.matmul %11, %13, %cst_9 {dimension_numbers = #tpu.dot_dimension_numbers<[1], [0], [0], [1], [0, 0, 1, 1], [], []>} : vector<8x128xf32>, vector<128x128xf32>, vector<8x128xf32> -> vector<8x128xf32>
    %15 = arith.addf %8, %14 : vector<8x128xf32>
    %16 = vector.extract_strided_slice %4 {offsets = [4, 0], sizes = [4, 128], strides = [1, 1]} : vector<12x128xf32> to vector<4x128xf32>
    %17 = vector.extract_strided_slice %7 {offsets = [4, 0], sizes = [4, 128], strides = [1, 1]} : vector<12x128xf32> to vector<4x128xf32>
    %18 = tpu.concatenate %16, %17 in 0 : vector<4x128xf32>, vector<4x128xf32> -> vector<8x128xf32>
    %c1 = arith.constant 1 : index
    %c0_10 = arith.constant 0 : index
    %c0_11 = arith.constant 0 : index
    %19 = vector.load %arg2[%c1, %c0_10, %c0_11] : memref<3x128x128xf32, #tpu.memory_space<vmem>>, vector<1x128x128xf32>
    %20 = vector.shape_cast %19 : vector<1x128x128xf32> to vector<128x128xf32>
    %cst_12 = arith.constant dense<0.000000e+00> : vector<8x128xf32>
    %21 = tpu.matmul %18, %20, %cst_12 {dimension_numbers = #tpu.dot_dimension_numbers<[1], [0], [0], [1], [0, 0, 1, 1], [], []>} : vector<8x128xf32>, vector<128x128xf32>, vector<8x128xf32> -> vector<8x128xf32>
    %22 = arith.addf %15, %21 : vector<8x128xf32>
    %23 = vector.extract_strided_slice %4 {offsets = [8, 0], sizes = [4, 128], strides = [1, 1]} : vector<12x128xf32> to vector<4x128xf32>
    %24 = vector.extract_strided_slice %7 {offsets = [8, 0], sizes = [4, 128], strides = [1, 1]} : vector<12x128xf32> to vector<4x128xf32>
    %25 = tpu.concatenate %23, %24 in 0 : vector<4x128xf32>, vector<4x128xf32> -> vector<8x128xf32>
    %c2 = arith.constant 2 : index
    %c0_13 = arith.constant 0 : index
    %c0_14 = arith.constant 0 : index
    %26 = vector.load %arg2[%c2, %c0_13, %c0_14] : memref<3x128x128xf32, #tpu.memory_space<vmem>>, vector<1x128x128xf32>
    %27 = vector.shape_cast %26 : vector<1x128x128xf32> to vector<128x128xf32>
    %cst_15 = arith.constant dense<0.000000e+00> : vector<8x128xf32>
    %28 = tpu.matmul %25, %27, %cst_15 {dimension_numbers = #tpu.dot_dimension_numbers<[1], [0], [0], [1], [0, 0, 1, 1], [], []>} : vector<8x128xf32>, vector<128x128xf32>, vector<8x128xf32> -> vector<8x128xf32>
    %29 = arith.addf %22, %28 : vector<8x128xf32>
    %30 = vector.shape_cast %29 : vector<8x128xf32> to vector<2x4x128xf32>
    %cst_16 = arith.constant dense<0.000000e+00> : vector<2x4xf32>
    %31 = vector.multi_reduction <add>, %30, %cst_16 [2] : vector<2x4x128xf32> to vector<2x4xf32>
    %32 = vector.shape_cast %31 : vector<2x4xf32> to vector<2x4x1xf32>
    %cst_17 = arith.constant dense<0.000000e+00> : vector<4x1xf32>
    %33 = vector.multi_reduction <add>, %32, %cst_17 [0] : vector<2x4x1xf32> to vector<4x1xf32>
    %34 = vector.shape_cast %33 : vector<4x1xf32> to vector<1x4x1xf32>
    %cst_18 = arith.constant 2.560000e+02 : f32
    %35 = vector.broadcast %cst_18 : f32 to vector<1x4x1xf32>
    %36 = arith.divf %34, %35 : vector<1x4x1xf32>
    %37 = vector.broadcast %36 : vector<1x4x1xf32> to vector<2x4x128xf32>
    %38 = arith.subf %30, %37 : vector<2x4x128xf32>
    %39 = arith.mulf %38, %38 : vector<2x4x128xf32>
    %cst_19 = arith.constant dense<0.000000e+00> : vector<2x4xf32>
    %40 = vector.multi_reduction <add>, %39, %cst_19 [2] : vector<2x4x128xf32> to vector<2x4xf32>
    %41 = vector.shape_cast %40 : vector<2x4xf32> to vector<2x4x1xf32>
    %cst_20 = arith.constant dense<0.000000e+00> : vector<4x1xf32>
    %42 = vector.multi_reduction <add>, %41, %cst_20 [0] : vector<2x4x1xf32> to vector<4x1xf32>
    %43 = vector.shape_cast %42 : vector<4x1xf32> to vector<1x4x1xf32>
    %cst_21 = arith.constant 2.560000e+02 : f32
    %44 = vector.broadcast %cst_21 : f32 to vector<1x4x1xf32>
    %45 = arith.divf %43, %44 : vector<1x4x1xf32>
    %cst_22 = arith.constant 9.99999974E-6 : f32
    %46 = vector.broadcast %cst_22 : f32 to vector<1x4x1xf32>
    %47 = arith.addf %45, %46 : vector<1x4x1xf32>
    %48 = math.rsqrt %47 : vector<1x4x1xf32>
    %c0_23 = arith.constant 0 : index
    %c0_24 = arith.constant 0 : index
    %c0_25 = arith.constant 0 : index
    %49 = vector.load %arg3[%c0_23, %c0_24, %c0_25] : memref<1x4x1xf32, #tpu.memory_space<vmem>>, vector<1x4x1xf32>
    %50 = vector.broadcast %48 : vector<1x4x1xf32> to vector<2x4x128xf32>
    %51 = arith.mulf %38, %50 : vector<2x4x128xf32>
    %52 = vector.broadcast %49 : vector<1x4x1xf32> to vector<2x4x128xf32>
    %53 = arith.mulf %52, %51 : vector<2x4x128xf32>
    %c0_26 = arith.constant 0 : index
    %c0_27 = arith.constant 0 : index
    %c0_28 = arith.constant 0 : index
    %54 = vector.load %arg4[%c0_26, %c0_27, %c0_28] : memref<1x4x1xf32, #tpu.memory_space<vmem>>, vector<1x4x1xf32>
    %55 = vector.broadcast %54 : vector<1x4x1xf32> to vector<2x4x128xf32>
    %56 = arith.addf %53, %55 : vector<2x4x128xf32>
    %cst_29 = arith.constant 0.000000e+00 : f32
    %57 = vector.broadcast %cst_29 : f32 to vector<2x4x128xf32>
    %58 = arith.maximumf %56, %57 : vector<2x4x128xf32>
    %59 = arith.addf %58, %0 : vector<2x4x128xf32>
    %cst_30 = arith.constant 0.000000e+00 : f32
    %60 = vector.broadcast %cst_30 : f32 to vector<2x4x128xf32>
    %61 = arith.maximumf %59, %60 : vector<2x4x128xf32>
    %c0_31 = arith.constant 0 : index
    %c0_32 = arith.constant 0 : index
    %c0_33 = arith.constant 0 : index
    %62 = vector.load %arg5[%c0_31, %c0_32, %c0_33] : memref<2x4x128xf32, #tpu.memory_space<vmem>>, vector<2x4x128xf32>
    tpu.vector_store %arg5[%c0_31, %c0_32, %c0_33], %61 {strides = array<i32>} : memref<2x4x128xf32, #tpu.memory_space<vmem>>, vector<2x4x128xf32>,
    return
  }
}

</mosaic_0001>

<bundles_post_ra>
// kernel: tpu_custom_call.1
= control target key start
LH: loop header
LB: loop body
LE: loop exit
PB: predicated region body
PF: predicated region fallthrough
CT: control target
= control target key end

     0   :  { %10 = vsyncpa [#allocation3], 0  ;;  %s473_s0 = inlined_call_operand.vmem [shape: f32[2,4,128], index: 0, kind: input, shape index: {}]   ;;  %s474_s1 = inlined_call_operand.vmem [shape: f32[12,4], index: 1, kind: input, shape index: {}]   ;;  %s475_s2 = inlined_call_operand.hbm [shape: f32[3,128,128], index: 2, kind: input, shape index: {}]   ;;  %s476_s3 = inlined_call_operand.vmem [shape: f32[1,4,1], index: 3, kind: input, shape index: {}]   ;;  %s477_s4 = inlined_call_operand.vmem [shape: f32[1,4,1], index: 4, kind: input, shape index: {}]   ;;  %s478_s5 = inlined_call_operand.hbm [shape: f32[2,4,128], index: 5, kind: output, shape index: {}]  }
   0x1   :  { %11 = vsyncpa [#allocation4], 0  ;;  %s20_s20 = sshll.u32 %s475_s2, 4  ;;  %s386_s21 = smov [#allocation2]   ;;  %s21_s20 = int_to_ptr.hbm [resolvable:$true] %s20_s20 }
   0x2   :  { %s22_s22 = sshll.u32 %s386_s21, 4  ;;  %s387_s23 = smov 128   ;;  %s23_s22 = int_to_ptr.vmem [resolvable:$true] %s22_s22 }
   0x3   :  { %s388_s24 = smov 8  }
   0x4   :  { %28 = dma.hbm_to_vmem [thread:$0]  %s21_s20, 6144, %s23_s22, [#allocation3], %s387_s23, %s387_s23, %s388_s24  }
   0x5   :  { %382 = dma.done.wait [#allocation3], 6144  }
   0x6   :  { %383 = vsyncadd [#allocation3], 4294961152  ;;  %vm48_vm0 = vcmask 1043456   ;;  %vm41_vm1 = vcmask 31744   ;;  %v430_v0 = vld [vmem:[%s473_s0] sm:$0xf] }
   0x7   :  { %v39_v1 = vld [vmem:[%s474_s1] sm:$0xff]  ;;  %314 = vmatpush.msk.msra.mxu1 %vm48_vm0, %v430_v0  ;;  %v141_v3 = vld [vmem:[#allocation2 + $0xf8] sm:$0xff]  ;;  %v140_v4 = vld [vmem:[#allocation2 + $0xf0] sm:$0xff]  ;;  %s301_s11 = sshll.u32 %s478_s5, 4  ;;  %s392_s12 = smov 64   ;;  %s302_s11 = int_to_ptr.hbm [resolvable:$true] %s301_s11 }
   0x8   :  { %v438_v2 = vld [vmem:[%s473_s0 + $0x4] sm:$0xf]  ;;  %315 = vmatmul.msk.f32.vlgmr.msra.gmra.mxu1 %vm41_vm1, %v39_v1  ;;  %142 = vmatpush.msra.mxu2 %v141_v3  ;;  %v120_v5 = vld [vmem:[#allocation2 + $0x78] sm:$0xff]  ;;  %v119_v6 = vld [vmem:[#allocation2 + $0x70] sm:$0xff]  ;;  %s393_s13 = smov 4  }
   0x9   :  { %317 = vmatpush.msk.msrb.mxu1 %vm48_vm0, %v438_v2  ;;  %162 = vmatpush.msra.mxu3 %v120_v5  ;;  %v139_v7 = vld [vmem:[#allocation2 + $0xe8] sm:$0xff]  ;;  %v138_v9 = vld [vmem:[#allocation2 + $0xe0] sm:$0xff]  ;;  %v202_v10 = vld [vmem:[#allocation2 + $0x178] sm:$0xff] }
   0xa   :  { %143 = vmatpush.msra.mxu2 %v140_v4  ;;  %v118_v8 = vld [vmem:[#allocation2 + $0x68] sm:$0xff]  ;;  %v117_v11 = vld [vmem:[#allocation2 + $0x60] sm:$0xff]  ;;  %203 = vmatpush.msra.mxu0 %v202_v10  ;;  %v201_v12 = vld [vmem:[#allocation2 + $0x170] sm:$0xff] }
   0xb   :  { %163 = vmatpush.msra.mxu3 %v119_v6  ;;  %v40_v13 = vld [vmem:[%s474_s1 + $0x8] sm:$0xf]  ;;  %v137_v14 = vld [vmem:[#allocation2 + $0xd8] sm:$0xff]  ;;  %v136_v16 = vld [vmem:[#allocation2 + $0xd0] sm:$0xff] }
   0xc   :  { %144 = vmatpush.msra.mxu2 %v139_v7  ;;  %v116_v15 = vld [vmem:[#allocation2 + $0x58] sm:$0xff]  ;;  %204 = vmatpush.msra.mxu0 %v201_v12  ;;  %v115_v17 = vld [vmem:[#allocation2 + $0x50] sm:$0xff]  ;;  %v135_v18 = vld [vmem:[#allocation2 + $0xc8] sm:$0xff]  ;;  %v390_v12 = vmov 0  }
   0xd   :  { %164 = vmatpush.msra.mxu3 %v118_v8  ;;  %v134_v19 = vld [vmem:[#allocation2 + $0xc0] sm:$0xff]  ;;  %v114_v20 = vld [vmem:[#allocation2 + $0x48] sm:$0xff]  ;;  %v133_v22 = vld [vmem:[#allocation2 + $0xb8] sm:$0xff]  ;;  %v389_v8 = vmov 256.0   ;;  %328 = vset.pattern.permute.xlu2 %v390_v12 }
   0xe   :  { %145 = vmatpush.msra.mxu2 %v138_v9  ;;  %v200_v21 = vld [vmem:[#allocation2 + $0x168] sm:$0xff]  ;;  %v113_v23 = vld [vmem:[#allocation2 + $0x40] sm:$0xff]  ;;  %v132_v25 = vld [vmem:[#allocation2 + $0xb0] sm:$0xff]  ;;  %330 = vrcp.f32 %v389_v8  ;;  %329 = vset.pattern.permute.xlu0 %v390_v12 }
   0xf   :  { %165 = vmatpush.msra.mxu3 %v117_v11  ;;  %v199_v24 = vld [vmem:[#allocation2 + $0x160] sm:$0xff]  ;;  %205 = vmatpush.msra.mxu0 %v200_v21  ;;  %v112_v26 = vld [vmem:[#allocation2 + $0x38] sm:$0xff]  ;;  %v131_v28 = vld [vmem:[#allocation2 + $0xa8] sm:$0xff] }
  0x10   :  { %316 = vmatmul.msk.f32.gmra.mxu1 %vm41_vm1, %v40_v13  ;;  %146 = vmatpush.msra.mxu2 %v137_v14  ;;  %v198_v27 = vld [vmem:[#allocation2 + $0x158] sm:$0xff]  ;;  %v111_v29 = vld [vmem:[#allocation2 + $0x30] sm:$0xff]  ;;  %v130_v31 = vld [vmem:[#allocation2 + $0xa0] sm:$0xff] }
  0x11   :  { %166 = vmatpush.msra.mxu3 %v116_v15  ;;  %206 = vmatpush.msra.mxu0 %v199_v24  ;;  %v197_v30 = vld [vmem:[#allocation2 + $0x150] sm:$0xff]  ;;  %v110_v32 = vld [vmem:[#allocation2 + $0x28] sm:$0xff]  ;;  %v129_v34 = vld [vmem:[#allocation2 + $0x98] sm:$0xff] }
  0x12   :  { %147 = vmatpush.msra.mxu2 %v136_v16  ;;  %v196_v33 = vld [vmem:[#allocation2 + $0x148] sm:$0xff]  ;;  %v109_v35 = vld [vmem:[#allocation2 + $0x20] sm:$0xff]  ;;  %v128_v37 = vld [vmem:[#allocation2 + $0x90] sm:$0xff] }
  0x13   :  { %167 = vmatpush.msra.mxu3 %v115_v17  ;;  %207 = vmatpush.msra.mxu0 %v198_v27  ;;  %v195_v36 = vld [vmem:[#allocation2 + $0x140] sm:$0xff]  ;;  %v108_v38 = vld [vmem:[#allocation2 + $0x18] sm:$0xff]  ;;  %v127_v40 = vld [vmem:[#allocation2 + $0x88] sm:$0xff] }
  0x14   :  { %148 = vmatpush.msra.mxu2 %v135_v18  ;;  %v194_v39 = vld [vmem:[#allocation2 + $0x138] sm:$0xff]  ;;  %v107_v41 = vld [vmem:[#allocation2 + $0x10] sm:$0xff]  ;;  %v126_v43 = vld [vmem:[#allocation2 + $0x80] sm:$0xff]  ;;  %v331_v9 = vpop.eup %330 }
  0x15   :  { %168 = vmatpush.msra.mxu3 %v114_v20  ;;  %208 = vmatpush.msra.mxu0 %v197_v30  ;;  %v193_v42 = vld [vmem:[#allocation2 + $0x130] sm:$0xff]  ;;  %v106_v44 = vld [vmem:[#allocation2 + $0x8] sm:$0xff]  ;;  %v105_v46 = vld [vmem:[#allocation2] sm:$0xff]  ;;  %v237_v10 = vmul.f32 256.0, %v331_v9  ;;  %vm241_vm2 = vweird.f32 %v331_v9 }
  0x16   :  { %149 = vmatpush.msra.mxu2 %v134_v19  ;;  %v192_v45 = vld [vmem:[#allocation2 + $0x128] sm:$0xff]  ;;  %v191_v47 = vld [vmem:[#allocation2 + $0x120] sm:$0xff]  ;;  %v190_v48 = vld [vmem:[#allocation2 + $0x118] sm:$0xff] }
  0x17   :  { %169 = vmatpush.msra.mxu3 %v113_v23  ;;  %209 = vmatpush.msra.mxu0 %v196_v33  ;;  %v189_v49 = vld [vmem:[#allocation2 + $0x110] sm:$0xff]  ;;  %v188_v50 = vld [vmem:[#allocation2 + $0x108] sm:$0xff]  ;;  %v187_v51 = vld [vmem:[#allocation2 + $0x100] sm:$0xff] }
  0x18   :  { %318 = vmatmul.msk.f32.vlgmr.msrb.gmra.mxu1 %vm41_vm1, %v39_v1  ;;  %150 = vmatpush.msra.mxu2 %v133_v22  ;;  %v269_v11 = vld [vmem:[%s476_s3] sm:$0xf]  ;;  %s391_s3 = smov [#allocation5]  }
  0x19   :  { %170 = vmatpush.msra.mxu3 %v112_v26  ;;  %210 = vmatpush.msra.mxu0 %v195_v36  ;;  %v279_v16 = vld [vmem:[%s477_s4] sm:$0xf]  ;;  %s299_s4 = sshll.u32 %s391_s3, 4  ;;  %s300_s4 = int_to_ptr.vmem [resolvable:$true] %s299_s4 }
  0x1a   :  { %151 = vmatpush.msra.mxu2 %v132_v25  ;;  %274 = vperm.xlu2 %328, %v269_v11  }
  0x1b   :  { %171 = vmatpush.msra.mxu3 %v111_v29  ;;  %211 = vmatpush.msra.mxu0 %v194_v39 }
  0x1c   :  { %152 = vmatpush.msra.mxu2 %v131_v28 }
  0x1d   :  { %172 = vmatpush.msra.mxu3 %v110_v32  ;;  %212 = vmatpush.msra.mxu0 %v193_v42 }
  0x1e   :  { %153 = vmatpush.msra.mxu2 %v130_v31 }
  0x1f   :  { %173 = vmatpush.msra.mxu3 %v109_v35  ;;  %213 = vmatpush.msra.mxu0 %v192_v45 }
  0x20   :  { %319 = vmatmul.msk.f32.gmra.mxu1 %vm41_vm1, %v40_v13  ;;  %154 = vmatpush.msra.mxu2 %v129_v34  ;;  %v238_v13 = vsub.f32 1.0, %v237_v10 }
  0x21   :  { %174 = vmatpush.msra.mxu3 %v108_v38  ;;  %214 = vmatpush.msra.mxu0 %v191_v47 }
  0x22   :  { %155 = vmatpush.msra.mxu2 %v128_v37  ;;  %v239_v15 = vmul.f32 %v331_v9, %v238_v13  ;;  %282 = vperm.xlu2 %328, %v279_v16  }
  0x23   :  { %175 = vmatpush.msra.mxu3 %v107_v41  ;;  %215 = vmatpush.msra.mxu0 %v190_v48 }
  0x24   :  { %156 = vmatpush.msra.mxu2 %v127_v40  ;;  %v240_v17 = vadd.f32 %v331_v9, %v239_v15 }
  0x25   :  { %176 = vmatpush.msra.mxu3 %v106_v44  ;;  %216 = vmatpush.msra.mxu0 %v189_v49 }
  0x26   :  { %157 = vmatpush.msra.mxu2 %v126_v43  ;;  %v242_v20 = vsel %vm241_vm2, %v331_v9, %v240_v17 }
  0x27   :  { %177 = vmatpush.msra.mxu3 %v105_v46  ;;  %217 = vmatpush.msra.mxu0 %v188_v50 }
  0x29   :  { %218 = vmatpush.msra.mxu0 %v187_v51 }
  0x74   :  { %v275_v41 = vpop.permute.xlu2 %274 }
  0x7c   :  { %v283_v49 = vpop.permute.xlu2 %282 }
  0x85   :  { %v69_v52 = vpop.f32.mrf.mxu1 }
  0x86   :  { %v122_v54 = vrot.slane %v69_v52, 4 }
  0x8d   :  { %v72_v53 = vpop.f32.mrf.mxu1 }
  0x95   :  { %v95_v55 = vpop.f32.mrf.mxu1 }
  0x96   :  { %v102_v56 = vrot.slane %v95_v55, 4  ;;  %v124_v57 = vsel %vm48_vm0, %v122_v54, %v95_v55 }
  0x97   :  { %158 = vmatmul.f32.vlgmr.msra.gmra.mxu2 %v124_v57 }
  0x98   :  { %v104_v58 = vsel %vm48_vm0, %v69_v52, %v102_v56 }
  0x99   :  { %178 = vmatmul.f32.vlgmr.msra.gmra.mxu3 %v104_v58 }
  0x9d   :  { %v98_v59 = vpop.f32.mrf.mxu1 }
  0x9e   :  { %v183_v60 = vrot.slane %v98_v59, 4 }
  0xa0   :  { %v185_v61 = vsel %vm48_vm0, %v72_v53, %v183_v60 }
  0xa1   :  { %219 = vmatmul.f32.vlgmr.msra.gmra.mxu0 %v185_v61 }
 0x11a   :  { %v159_v62 = vpop.f32.mrf.mxu2 }
 0x11c   :  { %v179_v63 = vpop.f32.mrf.mxu3 }
 0x11d   :  { %v180_v1 = vadd.f32 %v179_v63, %v159_v62 }
 0x11e   :  { %v220_v3 = vpop.f32.mrf.mxu0 }
 0x11f   :  { %v223_v4 = vadd.f32 %v220_v3, %v180_v1 }
 0x121   :  { %v227_v5 = vsel %vm48_vm0, %v223_v4, 0.0  ;;  %v225_v6 = vrot.slane %v223_v4, 4 }
 0x122   :  { %228 = vadd.xlane.f32.xlu0 %v227_v5 }
 0x123   :  { %v230_v7 = vsel %vm48_vm0, %v225_v6, 0.0 }
 0x12a   :  { %231 = vadd.xlane.f32.xlu0 %v230_v7 }
 0x195   :  { %v229_v14 = vpop.xlane.xlu0 %228 }
 0x196   :  { %v233_v19 = vsel %vm48_vm0, %v229_v14, 0.0 }
 0x19d   :  { %v232_v18 = vpop.xlane.xlu0 %231 }
 0x19e   :  { %v234_v21 = vsel %vm48_vm0, %v232_v18, 0.0 }
 0x19f   :  { %v235_v22 = vadd.f32 %v234_v21, %v233_v19 }
 0x1a1   :  { %v243_v23 = vmul.f32 %v242_v20, %v235_v22 }
 0x1a3   :  { %v244_v24 = vsub.f32 %v223_v4, %v243_v23  ;;  %v245_v27 = vsub.f32 %v225_v6, %v243_v23 }
 0x1a5   :  { %v246_v25 = vmul.f32 %v244_v24, %v244_v24  ;;  %v247_v28 = vmul.f32 %v245_v27, %v245_v27 }
 0x1a7   :  { %v248_v26 = vsel %vm48_vm0, %v246_v25, 0.0  ;;  %v251_v29 = vsel %vm48_vm0, %v247_v28, 0.0 }
 0x1a8   :  { %249 = vadd.xlane.f32.xlu1 %v248_v26 }
 0x1b0   :  { %252 = vadd.xlane.f32.xlu1 %v251_v29 }
 0x21b   :  { %v250_v30 = vpop.xlane.xlu1 %249 }
 0x21c   :  { %v254_v32 = vsel %vm48_vm0, %v250_v30, 0.0 }
 0x223   :  { %v253_v31 = vpop.xlane.xlu1 %252 }
 0x224   :  { %v255_v33 = vsel %vm48_vm0, %v253_v31, 0.0 }
 0x225   :  { %v256_v34 = vadd.f32 %v255_v33, %v254_v32 }
 0x227   :  { %v257_v35 = vmul.f32 %v256_v34, %v242_v20 }
 0x229   :  { %v258_v36 = vadd.f32 1e-05, %v257_v35 }
 0x22b   :  { %332 = vrsqrt.f32 %v258_v36  ;;  %vm265_vm4 = vweird.f32 %v258_v36 }
 0x231   :  { %v333_v37 = vpop.eup %332 }
 0x232   :  { %v260_v38 = vmul.f32 %v333_v37, %v258_v36  ;;  %vm266_vm3 = vweird.f32 %v333_v37 }
 0x233   :  { %vm267_vm5 = vmor %vm265_vm4, %vm266_vm3 }
 0x234   :  { %v261_v39 = vmul.f32 %v333_v37, %v260_v38 }
 0x236   :  { %v262_v40 = vmul.f32 0.5, %v261_v39 }
 0x238   :  { %v263_v42 = vsub.f32 1.5, %v262_v40 }
 0x23a   :  { %v264_v43 = vmul.f32 %v333_v37, %v263_v42 }
 0x23c   :  { %v268_v44 = vsel %vm267_vm5, %v333_v37, %v264_v43 }
 0x23d   :  { %v270_v45 = vmul.f32 %v268_v44, %v244_v24  ;;  %v271_v46 = vmul.f32 %v268_v44, %v245_v27 }
 0x23f   :  { %v277_v47 = vmul.f32 %v275_v41, %v270_v45  ;;  %v278_v48 = vmul.f32 %v275_v41, %v271_v46 }
 0x241   :  { %v285_v50 = vadd.f32 %v283_v49, %v277_v47  ;;  %v286_v51 = vadd.f32 %v283_v49, %v278_v48 }
 0x243   :  { %v287_v52 = vmax.f32 %v285_v50, 0.0  ;;  %v288_v53 = vmax.f32 %v286_v51, 0.0 }
 0x245   :  { %v289_v54 = vadd.f32 %v287_v52, %v430_v0  ;;  %v290_v55 = vadd.f32 %v288_v53, %v438_v2 }
 0x247   :  { %v291_v56 = vmax.f32 %v289_v54, 0.0  ;;  %v292_v57 = vmax.f32 %v290_v55, 0.0 }
 0x249   :  { %293 = vst [vmem:[#allocation5] sm:$0xf] %v291_v56 }
 0x24a   :  { %294 = vst [vmem:[#allocation5 + $0x4] sm:$0xf] %v292_v57 }
 0x24b   :  { %307 = dma.vmem_to_hbm [thread:$0]  %s300_s4, 128, %s302_s11, [#allocation4], %s392_s12, %s392_s12, %s393_s13  }
 0x24c   :  { %384 = dma.done.wait [#allocation4], 128  }
 0x24d   :  { %385 = vsyncadd [#allocation4], 4294967168 }
 0x24e   :  { %312 = vsyncpa [#allocation3], 1 }
 0x24f   :  { %313 = vsyncpa [#allocation4], 1 }

</bundles_post_ra>
